<compile_context>
chip_gen: v7x
topology: tpu7x:2x2x1
jax: 0.10.0
libtpu: 0.0.40
codegen_flags: <defaults>
</compile_context>

<pallas_src>
import math

import jax
import jax.numpy as jnp
from jax.experimental import pallas as pl
from jax.experimental.pallas import tpu as pltpu


_MAX_TB_SIN = 1024  # elementwise / store-bound path: big tiles amortize per-step overhead
_MAX_TB_MLP = 512   # MXU path: balance pipelining vs. VMEM


def _round_up(x, m):
    return ((x + m - 1) // m) * m


def _batch_tile(b, cap):
    """Rows per grid step.

    b < 16: single full-batch block (block shape == full array dims, so the
    (8,128) divisibility rule is trivially satisfied).  Otherwise pick a tile
    that is a multiple of 8 sublanes, gives >= 2 grid steps (so v7x's second
    TensorCore has work to split), and is capped at `cap`.  Ragged last blocks
    are handled by Pallas.
    """
    if b < 16:
        return b
    return min(cap, _round_up(pl.cdiv(b, 2), 8))


# ----------------------------------------------------------------------------
# Sinusoidal path
#   PyTorch: emb = time[:, None] * exp(arange(half) * -log(1e4)/(half-1))
#            out = cat([sin(emb), cos(emb)], -1)  (+ one zero column if dim odd)
# ----------------------------------------------------------------------------
def _sinusoidal_kernel(t_ref, freq_ref, phase_ref, o_ref):
    # t: (TB, 1) f32, freq/phase: (1, dim) f32, o: (TB, dim) f32.
    # Column j: sin(t*f_j)            for j < half        (phase 0)
    #           cos(t*f_{j-half})     for half <= j < 2h  (phase pi/2, single sin)
    #           0                     for the odd pad col (freq 0, phase 0 -> sin(0))
    o_ref[...] = jnp.sin(t_ref[...] * freq_ref[...] + phase_ref[...])


def _freq_phase_rows(dim):
    half = dim // 2
    # Exactly the buffer the PyTorch module registers (divide-by-zero for
    # half == 1 -> NaN is faithfully mirrored, as in the original module).
    emb = jnp.exp(
        jnp.arange(half, dtype=jnp.float32)
        * -(jnp.log(jnp.float32(10000.0)) / (half - 1))
    )
    pad = dim - 2 * half  # 1 if dim is odd else 0
    zeros_pad = jnp.zeros((pad,), jnp.float32)
    freq = jnp.concatenate([emb, emb, zeros_pad])
    phase = jnp.concatenate(
        [jnp.zeros((half,), jnp.float32),
         jnp.full((half,), math.pi / 2.0, dtype=jnp.float32),
         zeros_pad]
    )
    return freq.reshape(1, dim), phase.reshape(1, dim)


def sinusoidal_time_embedding(time, dim):
    b = time.shape[0]
    tb = _batch_tile(b, _MAX_TB_SIN)
    t2 = time.astype(jnp.float32).reshape(b, 1)
    freq, phase = _freq_phase_rows(dim)

    return pl.pallas_call(
        _sinusoidal_kernel,
        out_shape=jax.ShapeDtypeStruct((b, dim), jnp.float32),
        grid=(pl.cdiv(b, tb),),
        in_specs=[
            pl.BlockSpec((tb, 1), lambda i: (i, 0)),
            pl.BlockSpec((1, dim), lambda i: (0, 0)),   # constant index -> fetched once
            pl.BlockSpec((1, dim), lambda i: (0, 0)),
        ],
        out_specs=pl.BlockSpec((tb, dim), lambda i: (i, 0)),
        compiler_params=pltpu.CompilerParams(dimension_semantics=("parallel",)),
    )(t2, freq, phase)


# ----------------------------------------------------------------------------
# Linear (MLP) path:  Linear(1, hidden) -> ReLU -> Linear(hidden, dim)
#   Weights are passed already transposed: w1 = W1.T (1, H), w2 = W2.T (H, D).
# ----------------------------------------------------------------------------
def _linear_mlp_kernel(t_ref, w1_ref, b1_ref, w2_ref, b2_ref, o_ref):
    # t: (TB,1) f32, w1/b1: (1,H) f32, w2: (H,D) bf16, b2: (1,D) f32, o: (TB,D) f32
    h = jnp.maximum(t_ref[...] * w1_ref[...] + b1_ref[...], 0.0)  # K=1 Linear + ReLU on VPU
    o_ref[...] = (
        jnp.dot(h.astype(jnp.bfloat16), w2_ref[...],
                preferred_element_type=jnp.float32)               # bf16 MXU, f32 accumulate
        + b2_ref[...]
    )


def linear_time_embedding(time, w1, b1, w2, b2):
    b = time.shape[0]
    hidden = w1.shape[-1]
    dim = w2.shape[-1]
    tb = _batch_tile(b, _MAX_TB_MLP)
    t2 = time.astype(jnp.float32).reshape(b, 1)

    # Per-step VMEM at hidden_dim=1024, dim=1024, tb=512: out 2 MiB + h 2 MiB
    # + bf16 w2 2 MiB (+double buffering of the batch-indexed blocks) -- well
    # under every generation's scoped VMEM default, so no vmem_limit override.
    return pl.pallas_call(
        _linear_mlp_kernel,
        out_shape=jax.ShapeDtypeStruct((b, dim), jnp.float32),
        grid=(pl.cdiv(b, tb),),
        in_specs=[
            pl.BlockSpec((tb, 1), lambda i: (i, 0)),
            pl.BlockSpec((1, hidden), lambda i: (0, 0)),
            pl.BlockSpec((1, hidden), lambda i: (0, 0)),
            pl.BlockSpec((hidden, dim), lambda i: (0, 0)),
            pl.BlockSpec((1, dim), lambda i: (0, 0)),
        ],
        out_specs=pl.BlockSpec((tb, dim), lambda i: (i, 0)),
        compiler_params=pltpu.CompilerParams(dimension_semantics=("parallel",)),
    )(
        t2,
        w1.reshape(1, hidden).astype(jnp.float32),
        b1.reshape(1, hidden).astype(jnp.float32),
        w2.astype(jnp.bfloat16),
        b2.reshape(1, dim).astype(jnp.float32),
    )


# ----------------------------------------------------------------------------
# Pure-JAX references (mirror the PyTorch forward)
# ----------------------------------------------------------------------------
def _sinusoidal_ref(time, dim):
    half = dim // 2
    emb = jnp.exp(
        jnp.arange(half, dtype=jnp.float32)
        * -(jnp.log(jnp.float32(10000.0)) / (half - 1))
    )
    e = time.astype(jnp.float32)[:, None] * emb[None, :]
    out = jnp.concatenate([jnp.sin(e), jnp.cos(e)], axis=-1)
    if dim % 2 == 1:
        out = jnp.pad(out, ((0, 0), (0, 1)))
    return out


def _linear_ref(time, w1, b1, w2, b2):
    x = time.astype(jnp.float32)[:, None]
    h = jnp.maximum(x @ w1 + b1[None, :], 0.0)
    return h @ w2 + b2[None, :]


def _rel_err(a, b):
    return jnp.linalg.norm(a - b) / (jnp.linalg.norm(b) + 1e-12)


if __name__ == "__main__":
    key = jax.random.PRNGKey(0)
    k_t, k_w1, k_b1, k_w2, k_b2, k_t2 = jax.random.split(key, 6)

    B = 8
    DIM = 32
    HIDDEN = 32  # small stand-in for the module's hidden_dim=1024

    # diffusion timesteps (float), deterministic
    time = jax.random.uniform(k_t, (B,), jnp.float32, minval=0.0, maxval=1000.0)

    # --- sinusoidal path (default embedding_type) ---
    # Tolerance: sin(x + fl(pi/2)) vs cos(x) differs by <= ulp(x)/2 ~ 3e-5 at
    # x ~ 1e3 (phase-trick argument rounding); 5e-4 leaves ample headroom for
    # hardware sin approximation differences.
    out_sin = sinusoidal_time_embedding(time, DIM)
    jax.block_until_ready(out_sin)
    ref_sin = _sinusoidal_ref(time, DIM)
    assert out_sin.shape == (B, DIM)
    assert jnp.allclose(out_sin, ref_sin, atol=5e-4, rtol=1e-4)

    # odd dim -> trailing zero-pad column (freq=0, phase=0 -> sin(0)=0 exactly)
    out_odd = sinusoidal_time_embedding(time, 33)
    jax.block_until_ready(out_odd)
    assert out_odd.shape == (B, 33)
    assert jnp.allclose(out_odd, _sinusoidal_ref(time, 33), atol=5e-4, rtol=1e-4)
    assert jnp.all(out_odd[:, -1] == 0.0)

    # batch large enough for >1 grid step (exercises tiling + ragged last block)
    time_big = jax.random.uniform(k_t2, (300,), jnp.float32, minval=0.0, maxval=1000.0)
    out_big = sinusoidal_time_embedding(time_big, DIM)
    jax.block_until_ready(out_big)
    assert out_big.shape == (300, DIM)
    assert jnp.allclose(out_big, _sinusoidal_ref(time_big, DIM), atol=5e-4, rtol=1e-4)

    # --- linear path (embedding_type='linear') ---
    w1 = jax.random.normal(k_w1, (1, HIDDEN), jnp.float32) * 0.1
    b1 = jax.random.normal(k_b1, (HIDDEN,), jnp.float32) * 0.1
    w2 = jax.random.normal(k_w2, (HIDDEN, DIM), jnp.float32) * 0.1
    b2 = jax.random.normal(k_b2, (DIM,), jnp.float32) * 0.1

    out_lin = linear_time_embedding(time, w1, b1, w2, b2)
    jax.block_until_ready(out_lin)
    ref_lin = _linear_ref(time, w1, b1, w2, b2)
    assert out_lin.shape == (B, DIM)
    # Second GEMM runs in bf16 (f32 accumulate) -> ~0.4% relative error vs f32 ref.
    assert _rel_err(out_lin, ref_lin) < 2e-2

    # MLP with >1 grid step
    time_mlp = jax.random.uniform(k_t2, (40,), jnp.float32, minval=0.0, maxval=1000.0)
    out_lin2 = linear_time_embedding(time_mlp, w1, b1, w2, b2)
    jax.block_until_ready(out_lin2)
    assert out_lin2.shape == (40, DIM)
    assert _rel_err(out_lin2, _linear_ref(time_mlp, w1, b1, w2, b2)) < 2e-2

    print("KERNEL_OK")
</pallas_src>

<mosaic_0001>
module attributes {stable_mosaic.version = 11 : i64} {
  func.func @_sinusoidal_kernel(%arg0: i32, %arg1: memref<8x1xf32, #tpu.memory_space<vmem>>, %arg2: memref<1x32xf32, #tpu.memory_space<vmem>>, %arg3: memref<1x32xf32, #tpu.memory_space<vmem>>, %arg4: memref<8x32xf32, #tpu.memory_space<vmem>>) attributes {dimension_semantics = [#tpu.dimension_semantics<parallel>], iteration_bounds = array<i64: 1>, scalar_prefetch = 0 : i64, scratch_operands = 0 : i64, tpu.core_type = #tpu.core_type<tc>, window_params = [{transform_indices = @transform_0, window_bounds = array<i64: 8, 1>}, {pipeline_mode = #tpu.pipeline_mode<synchronous>, transform_indices = @transform_1, window_bounds = array<i64: 1, 32>}, {pipeline_mode = #tpu.pipeline_mode<synchronous>, transform_indices = @transform_2, window_bounds = array<i64: 1, 32>}, {transform_indices = @transform_3, window_bounds = array<i64: 8, 32>}]} {
    %c0 = arith.constant 0 : index
    %c0_0 = arith.constant 0 : index
    %0 = vector.load %arg1[%c0, %c0_0] : memref<8x1xf32, #tpu.memory_space<vmem>>, vector<8x1xf32>
    %c0_1 = arith.constant 0 : index
    %c0_2 = arith.constant 0 : index
    %1 = vector.load %arg2[%c0_1, %c0_2] : memref<1x32xf32, #tpu.memory_space<vmem>>, vector<1x32xf32>
    %2 = vector.broadcast %0 : vector<8x1xf32> to vector<8x32xf32>
    %3 = vector.broadcast %1 : vector<1x32xf32> to vector<8x32xf32>
    %4 = arith.mulf %2, %3 : vector<8x32xf32>
    %c0_3 = arith.constant 0 : index
    %c0_4 = arith.constant 0 : index
    %5 = vector.load %arg3[%c0_3, %c0_4] : memref<1x32xf32, #tpu.memory_space<vmem>>, vector<1x32xf32>
    %6 = vector.broadcast %5 : vector<1x32xf32> to vector<8x32xf32>
    %7 = arith.addf %4, %6 : vector<8x32xf32>
    %8 = math.sin %7 : vector<8x32xf32>
    %c0_5 = arith.constant 0 : index
    %c0_6 = arith.constant 0 : index
    %9 = vector.load %arg4[%c0_5, %c0_6] : memref<8x32xf32, #tpu.memory_space<vmem>>, vector<8x32xf32>
    tpu.vector_store %arg4[%c0_5, %c0_6], %8 {strides = array<i32>} : memref<8x32xf32, #tpu.memory_space<vmem>>, vector<8x32xf32>,
    return
  }
  func.func @transform_0(%arg0: i32) -> (i32, i32) {
    %c0_i32 = arith.constant 0 : i32
    %c0_i32_0 = arith.constant 0 : i32
    return %arg0, %c0_i32 : i32, i32
  }
  func.func @transform_1(%arg0: i32) -> (i32, i32) {
    %c0_i32 = arith.constant 0 : i32
    %c0_i32_0 = arith.constant 0 : i32
    %c0_i32_1 = arith.constant 0 : i32
    return %c0_i32, %c0_i32_0 : i32, i32
  }
  func.func @transform_2(%arg0: i32) -> (i32, i32) {
    %c0_i32 = arith.constant 0 : i32
    %c0_i32_0 = arith.constant 0 : i32
    %c0_i32_1 = arith.constant 0 : i32
    return %c0_i32, %c0_i32_0 : i32, i32
  }
  func.func @transform_3(%arg0: i32) -> (i32, i32) {
    %c0_i32 = arith.constant 0 : i32
    %c0_i32_0 = arith.constant 0 : i32
    return %arg0, %c0_i32 : i32, i32
  }
}

</mosaic_0001>

<bundles_post_ra>
// kernel: tpu_custom_call.1
= control target key start
LH: loop header
LB: loop body
LE: loop exit
PB: predicated region body
PF: predicated region fallthrough
CT: control target
= control target key end

     0   :  { %v204_v1 = vmov 0   ;;  %s274_s0 = inlined_call_operand.vmem [shape: f32[8,1], index: 0, kind: input, shape index: {}]   ;;  %s275_s1 = inlined_call_operand.vmem [shape: f32[1,32], index: 1, kind: input, shape index: {}]   ;;  %s276_s2 = inlined_call_operand.vmem [shape: f32[1,32], index: 2, kind: input, shape index: {}]   ;;  %s277_s3 = inlined_call_operand.hbm [shape: f32[8,32], index: 3, kind: output, shape index: {}]  }
   0x1   :  { %v15_v0 = vld [vmem:[%s274_s0] sm:$0xff]  ;;  %175 = vset.pattern.permute.xlu0 %v204_v1 }
   0x2   :  { %19 = vperm.xlu0 %175, %v15_v0  }
   0x3   :  { %8 = vsyncpa [#allocation3], 0  ;;  %v157_v2 = vld [vmem:[%s275_s1] ss:$0 sm:$0xff]  ;;  %v205_v18 = vmov 2102212464  }
   0x4   :  { %v158_v3 = vld [vmem:[%s276_s2] ss:$0 sm:$0xff]  ;;  %v206_v20 = vmov 920167782   ;;  %v207_v24 = vmov 1326507024  }
   0x5   :  { %v208_v26 = vmov 683565275   ;;  %v209_v28 = vmov 2475754826   ;;  %v210_v31 = vmov 2131351028  }
   0x6   :  { %s211_s0 = smov [#allocation2]   ;;  %vm141_vm12 = vcmask 261120  }
   0x7   :  { %s149_s1 = sshll.u32 %s211_s0, 4  ;;  %s150_s1 = int_to_ptr.vmem [resolvable:$true] %s149_s1 }
   0x8   :  { %s180_s2 = scalar_lea.vmem %s150_s1, 128  ;;  %p185_p1 = scmp.lt.s32.totalorder %s150_s1, %s150_s1 }
   0x9   :  { %p181_p0 = scmp.ne.s32.totalorder %s150_s1, %s180_s2  ;;  %p186_p2 = scmp.lt.s32.totalorder %s180_s2, %s180_s2 }
   0xb   :  { %p187_p3 = por %p186_p2, %p185_p1 }
   0xd   :  { %p188_p4 = pnand %p187_p3, %p181_p0 }
  0x81   :  { %v20_v4 = vpop.permute.xlu0 %19 }
  0x82   :  { %v28_v5 = vmul.f32 %v157_v2, %v20_v4 }
  0x84   :  { %v241_v6 = vadd.f32 %v158_v3, %v28_v5 }
  0x86   :  { %v40_v7 = vand.u32 2139095040, %v241_v6  ;;  %v37_v8 = vand.u32 2147483647, %v241_v6  ;;  %vm39_vm7 = vcmp.lt.s32.totalorder %v241_v6, 0  ;;  %vm129_vm13 = vweird.f32 %v241_v6 }
  0x88   :  { %v41_v9 = vshrl.u32 %v40_v7, 23  ;;  %v44_v11 = vand.u32 8388607, %v37_v8  ;;  %vm38_vm8 = vcmp.le.f32.partialorder %v37_v8, 0.7853982 }
  0x8a   :  { %v159_v10 = vadd.s32 4294967169, %v41_v9  ;;  %v45_v14 = vor.u32 8388608, %v44_v11 }
  0x8c   :  { %v47_v12 = vadd.s32 1, %v159_v10  ;;  %v85_v22 = vshll.u32 %v45_v14, 8 }
  0x8e   :  { %vm48_vm0 = vcmp.gt.s32.totalorder %v47_v12, 0 }
  0x8f   :  { %v49_v13 = vsel %vm48_vm0, %v47_v12, 0 }
  0x90   :  { %v51_v15 = vand.u32 31, %v49_v13  ;;  %v50_v16 = vshrl.u32 %v49_v13, 5 }
  0x92   :  { %v52_v17 = vsub.s32 32, %v51_v15  ;;  %v63_v19 = vshll.u32 %v205_v18, %v51_v15  ;;  %v66_v21 = vshll.u32 %v206_v20, %v51_v15  ;;  %v54_v27 = vshll.u32 %v208_v26, %v51_v15 }
  0x93   :  { %v57_v30 = vshll.u32 %v209_v28, %v51_v15  ;;  %v60_v33 = vshll.u32 %v210_v31, %v51_v15  ;;  %vm72_vm1 = vcmp.lt.s32.totalorder %v50_v16, 4  ;;  %vm69_vm2 = vcmp.lt.s32.totalorder %v50_v16, 1 }
  0x94   :  { %v64_v23 = vshrl.u32 %v206_v20, %v52_v17  ;;  %v67_v25 = vshrl.u32 %v207_v24, %v52_v17  ;;  %v55_v29 = vshrl.u32 %v209_v28, %v52_v17  ;;  %v58_v32 = vshrl.u32 %v210_v31, %v52_v17 }
  0x95   :  { %v61_v34 = vshrl.u32 %v205_v18, %v52_v17  ;;  %v53_v38 = vshrl.u32 %v208_v26, %v52_v17  ;;  %vm70_vm3 = vcmp.lt.s32.totalorder %v50_v16, 2  ;;  %vm71_vm4 = vcmp.lt.s32.totalorder %v50_v16, 3 }
  0x96   :  { %v65_v35 = vor.u32 %v64_v23, %v63_v19  ;;  %v68_v36 = vor.u32 %v67_v25, %v66_v21  ;;  %v56_v37 = vor.u32 %v55_v29, %v54_v27  ;;  %v59_v39 = vor.u32 %v58_v32, %v57_v30 }
  0x97   :  { %v62_v40 = vor.u32 %v61_v34, %v60_v33 }
  0x98   :  { %v78_v41 = vsel %vm72_vm1, %v65_v35, 920167782  ;;  %v82_v42 = vsel %vm72_vm1, %v68_v36, 1326507024  ;;  %v77_v44 = vsel %vm69_vm2, %v56_v37, %v59_v39  ;;  %v73_v47 = vsel %vm69_vm2, %v53_v38, %v56_v37 }
  0x99   :  { %v74_v43 = vsel %vm72_vm1, %v62_v40, 2102212464  ;;  %v79_v45 = vsel %vm71_vm4, %v62_v40, %v78_v41  ;;  %v81_v46 = vsel %vm69_vm2, %v59_v39, %v62_v40  ;;  %v83_v50 = vsel %vm71_vm4, %v65_v35, %v82_v42 }
  0x9a   :  { %v75_v48 = vsel %vm71_vm4, %v59_v39, %v74_v43  ;;  %v80_v49 = vsel %vm70_vm3, %v77_v44, %v79_v45  ;;  %v84_v51 = vsel %vm70_vm3, %v81_v46, %v83_v50 }
  0x9b   :  { %v247_v52 = vmul.u32.u64.low %v85_v22, %v80_v49  ;;  %v248_v53 = vmul.u32.u64.high %v85_v22, %v80_v49, %v247_v52  ;;  %v250_v54 = vmul.u32.u64.low %v85_v22, %v84_v51  ;;  %v251_v55 = vmul.u32.u64.high %v85_v22, %v84_v51, %v250_v54 }
  0x9c   :  { %v76_v56 = vsel %vm70_vm3, %v73_v47, %v75_v48 }
  0x9d   :  { %v95_v57 = vadd.s32 1, %v248_v53  ;;  %v92_v58 = vmul.u32 %v85_v22, %v76_v56  ;;  %vm94_vm5 = vc.u32 %v251_v55, %v247_v52  ;;  %v93_v7 = vadd.s32 %v247_v52, %v251_v55 }
  0x9f   :  { %v96_v59 = vsel %vm94_vm5, %v95_v57, %v248_v53 }
  0xa0   :  { %v97_v60 = vadd.s32 %v96_v59, %v92_v58 }
  0xa2   :  { %v98_v61 = vadd.s32 536870912, %v97_v60 }
  0xa4   :  { %v99_v62 = vshrl.u32 %v98_v61, 30 }
  0xa6   :  { %v100_v63 = vshll.u32 %v99_v62, 30  ;;  %v123_v20 = vsub.s32 4, %v99_v62 }
  0xa8   :  { %v101_v0 = vsub.s32 %v97_v60, %v100_v63  ;;  %v124_v23 = vsel %vm39_vm7, %v123_v20, %v99_v62 }
  0xa9   :  { %v126_v25 = vsel %vm38_vm8, 0, %v124_v23 }
  0xaa   :  { %v103_v1 = vsub.s32 0, %v101_v0  ;;  %v130_v26 = vadd.s32 3, %v126_v25 }
  0xac   :  { %v160_v2 = vmin.u32 %v103_v1, %v101_v0  ;;  %v131_v27 = vand.u32 3, %v130_v26 }
  0xae   :  { %v105_v3 = vclz %v160_v2  ;;  %vm136_vm9 = vcmp.eq.s32.totalorder %v131_v27, 2  ;;  %vm133_vm10 = vcmp.eq.s32.totalorder %v131_v27, 0  ;;  %vm132_vm11 = vcmp.lt.s32.totalorder %v131_v27, 2 }
  0xb0   :  { %v161_v4 = vadd.s32 4294967294, %v105_v3 }
  0xb2   :  { %vm162_vm6 = vcmp.lt.s32.totalorder %v161_v4, 0 }
  0xb3   :  { %v108_v5 = vsel %vm162_vm6, 0, %v161_v4 }
  0xb4   :  { %v109_v9 = vsub.s32 32, %v108_v5  ;;  %v113_v10 = vsub.s32 4294967266, %v108_v5  ;;  %v110_v11 = vshll.u32 %v101_v0, %v108_v5 }
  0xb6   :  { %v111_v12 = vshrl.u32 %v93_v7, %v109_v9  ;;  %v114_v13 = vadd.s32 127, %v113_v10 }
  0xb8   :  { %v112_v14 = vor.u32 %v111_v12, %v110_v11  ;;  %v115_v15 = vshll.u32 %v114_v13, 23 }
  0xba   :  { %v116_v16 = vor.u32 4788187, %v115_v15  ;;  %v119_v18 = vcvt.s32.f32 %v112_v14 }
  0xbc   :  { %v117_v17 = vand.u32 2147483647, %v116_v16 }
  0xbe   :  { %v120_v19 = vmul.f32 %v119_v18, %v117_v17 }
  0xc0   :  { %v121_v21 = vxor.u32 2147483648, %v120_v19 }
  0xc2   :  { %v122_v22 = vsel %vm39_vm7, %v121_v21, %v120_v19 }
  0xc3   :  { %v125_v24 = vsel %vm38_vm8, %v241_v6, %v122_v22 }
  0xc4   :  { %176 = vcosq.f32 %v125_v24 }
  0xc5   :  { %178 = vsinq.f32 %v125_v24 }
  0xce   :  { %v177_v28 = vpop.eup %176 }
  0xcf   :  { %v179_v29 = vpop.eup %178  ;;  %v137_v30 = vxor.u32 2147483648, %v177_v28 }
  0xd0   :  { %v134_v31 = vxor.u32 2147483648, %v179_v29 }
  0xd1   :  { %v138_v32 = vsel %vm136_vm9, %v137_v30, %v179_v29 }
  0xd2   :  { %v135_v8 = vsel %vm133_vm10, %v177_v28, %v134_v31 }
  0xd3   :  { %v139_v33 = vsel %vm132_vm11, %v135_v8, %v138_v32 }
  0xd4   :  { %v140_v34 = vsel %vm129_vm13, nan, %v139_v33 }
  0xd5   :  { %142 = vst.msk [vmem:[#allocation2] sm:$0xff] %vm141_vm12, %v140_v34 }
  0xd6   :  { %191 = shalt.err (!%p188_p4)
}
  0xd7   :  { %s192_s20 = scalar_lea.hbm %s277_s3, 128 }
  0xd8   :  { %p193_p5 = scmp.ne.s32.totalorder %s277_s3, %s192_s20  ;;  %p196_p6 = scmp.lt.u32.totalorder %s192_s20, %s277_s3 }
  0xda   :  { %p198_p7 = pnand %p196_p6, %p193_p5 }
  0xdc   :  { %201 = shalt.err (!%p198_p7)
}
  0xdd   :  { %152 = dma.vmem_to_hbm [thread:$0]  %s150_s1, 128, %s277_s3, [#allocation3]  }
  0xde   :  { %202 = dma.done.wait [#allocation3], 128  }
  0xdf   :  { %203 = vsyncadd [#allocation3], 4294967168 }
  0xe0   :  { %156 = vsyncpa [#allocation3], 1 }

</bundles_post_ra>
